<compile_context>
chip_gen: v7x
topology: tpu7x:2x2x1
jax: 0.10.0
libtpu: 0.0.40
codegen_flags: <defaults>
</compile_context>

<pallas_src>
import functools

import jax
import jax.numpy as jnp
import numpy as np
from jax.experimental import pallas as pl
from jax.experimental.pallas import tpu as pltpu


def _vmem_limit_bytes():
    """~3/4 of physical VMEM (falls back to a v7x-safe default)."""
    cap = 64 * 1024 * 1024
    try:
        cap = int(getattr(pltpu.get_tpu_info(), "vmem_capacity_bytes", cap))
    except Exception:
        pass
    return (3 * cap) // 4


def _pick_p_tile(HW, C, H, W, vmem_budget):
    """Largest pixel tile (multiple of 128, divisor of HW) whose working set fits."""
    per_p = 4 * (C * H + W + H + 6 * C + 16)      # f32 intermediates that scale with P
    fixed = 2 * (C * H * W * 2)                   # double-buffered bf16 frame2
    divisors = [c for c in (2048, 1024, 512, 256, 128) if HW % c == 0]
    for cand in divisors:                         # biggest first
        if fixed + per_p * cand <= vmem_budget:
            return cand
    if divisors:
        return divisors[-1]
    return HW                                     # tiny images: whole image in one tile


def _photometric_kernel(coord_ref, f1_ref, f2_ref, flow_ref, out_ref,
                        *, H, W, C, P, delta, alpha):
    # coord_ref : (2, P)    f32   row 0 = x (col), row 1 = y (row) for this pixel tile
    # f1_ref    : (C, P)    f32   frame1 pixels for this tile
    # f2_ref    : (C*H, W)  bf16  full frame2 image (rows grouped per channel)
    # flow_ref  : (2, P)    f32   flow for this tile
    # out_ref   : (8, 128)  f32   per-(batch, tile) partial-sum slab

    # grid_sample coords (align_corners=True, padding_mode='border'), algebraically folded:
    #   ix = clip((cx + fx) * (W-1)/W, 0, W-1)
    ix = jnp.clip((coord_ref[0:1, :] + flow_ref[0:1, :]) * (float(W - 1) / float(W)),
                  0.0, float(W - 1))                                # (1, P)
    iy = jnp.clip((coord_ref[1:2, :] + flow_ref[1:2, :]) * (float(H - 1) / float(H)),
                  0.0, float(H - 1))                                # (1, P)

    # Closed-form separable bilinear "tent" weights; their outer product over (qy, qx)
    # is exactly the 4-tap bilinear kernel (including the x0==x1 border corner case).
    qx = jax.lax.broadcasted_iota(jnp.int32, (W, P), 0).astype(jnp.float32)
    qy = jax.lax.broadcasted_iota(jnp.int32, (H, P), 0).astype(jnp.float32)
    colw = jnp.maximum(1.0 - jnp.abs(qx - ix), 0.0)                 # (W, P)
    roww = jnp.maximum(1.0 - jnp.abs(qy - iy), 0.0)                 # (H, P)

    # Stage 1 (MXU, bf16 operands, f32 accumulate): horizontal interpolation for all
    # channels & rows at once:  t[(c,h), p] = sum_qx frame2[c, h, qx] * colw[qx, p].
    t = jnp.dot(f2_ref[...], colw.astype(jnp.bfloat16),
                preferred_element_type=jnp.float32)                 # (C*H, P)

    # Stage 2 (VPU, fused across channels): vertical interpolation + loss term.
    t3 = t.reshape(C, H, P)                       # free relayout when H % 8 == 0
    warped = jnp.sum(t3 * roww[None, :, :], axis=1)                 # (C, P)
    photo = f1_ref[...] - warped                                    # (C, P)
    base = photo * photo + float(delta) * float(delta)
    # base**alpha via EUP exp/log (base > 0 for delta != 0; exp(alpha*log(0)) -> 0 otherwise).
    val = jnp.exp(float(alpha) * jnp.log(base))                     # (C, P)

    # Fold pixels into 128 lanes and channels into 8 sublanes -> one full (8,128) store.
    if P % 128 == 0:
        folded = val[:, 0:128]
        for k in range(1, P // 128):
            folded = folded + val[:, k * 128:(k + 1) * 128]         # (C, 128)
        if C < 8:
            slab = jnp.concatenate(
                [folded, jnp.zeros((8 - C, 128), jnp.float32)], axis=0)
        elif C == 8:
            slab = folded
        else:
            ctot = jnp.sum(folded, axis=0, keepdims=True)           # (1, 128)
            slab = jnp.concatenate(
                [ctot, jnp.zeros((7, 128), jnp.float32)], axis=0)
    else:
        total = jnp.sum(val)
        sub = jax.lax.broadcasted_iota(jnp.int32, (8, 128), 0)
        lane = jax.lax.broadcasted_iota(jnp.int32, (8, 128), 1)
        slab = jnp.where((sub == 0) & (lane == 0), total, 0.0)

    out_ref[...] = slab


def photometric_loss(frame1, frame2, flow, delta, alpha):
    """Pallas implementation of PhotoMetric(delta, alpha)(frame1, frame2, flow)."""
    N, C, H, W = frame1.shape
    assert flow.shape == (N, 2, H, W)
    HW = H * W

    vmem_limit = _vmem_limit_bytes()
    P = _pick_p_tile(HW, C, H, W, (3 * vmem_limit) // 4)   # leave compiler headroom
    n_tiles = HW // P

    f1 = frame1.reshape(N, C, HW).astype(jnp.float32)
    # frame2 goes through the MXU in bf16 (f32 accumulate): ~1e-3 relative error on the
    # loss vs an all-f32 reference — the test tolerance below is set deliberately.
    f2 = frame2.reshape(N, C * H, W).astype(jnp.bfloat16)
    fl = flow.reshape(N, 2, HW).astype(jnp.float32)

    # Flattened meshgrid: p = h*W + w  ->  x = w, y = h (matches torch meshgrid+transpose).
    cx = jnp.tile(jnp.arange(W, dtype=jnp.float32), (H,)).reshape(1, HW)
    cy = jnp.repeat(jnp.arange(H, dtype=jnp.float32), W).reshape(1, HW)
    coord = jnp.concatenate([cx, cy], axis=0)                # (2, HW)

    kernel = functools.partial(_photometric_kernel, H=H, W=W, C=C, P=P,
                               delta=float(delta), alpha=float(alpha))

    out = pl.pallas_call(
        kernel,
        out_shape=jax.ShapeDtypeStruct((N, n_tiles, 8, 128), jnp.float32),
        grid_spec=pltpu.PrefetchScalarGridSpec(
            num_scalar_prefetch=0,
            grid=(N, n_tiles),                                        # (batch, pixel-tile)
            in_specs=[
                pl.BlockSpec((2, P), lambda n, p: (0, p)),            # coords (tile)
                pl.BlockSpec((None, C, P), lambda n, p: (n, 0, p)),   # frame1[n] tile
                pl.BlockSpec((None, C * H, W), lambda n, p: (n, 0, 0)),  # frame2[n] full
                pl.BlockSpec((None, 2, P), lambda n, p: (n, 0, p)),   # flow[n] tile
            ],
            out_specs=pl.BlockSpec((None, None, 8, 128),
                                   lambda n, p: (n, p, 0, 0)),        # per-tile slab
        ),
        compiler_params=pltpu.CompilerParams(
            dimension_semantics=("parallel", "parallel"),   # both axes independent
            vmem_limit_bytes=int(vmem_limit)),
    )(coord, f1, f2, fl)

    # TODO(synk): v5e large-W MXU-bound case — band-limit the colw contraction
    # (K = column block + 2*ceil(max|flow|)) when a flow-magnitude bound is known.
    return jnp.sum(out)


def _reference_loss(frame1, frame2, flow, delta, alpha):
    """Pure-JAX reference of the PyTorch forward (for a correctness check)."""
    N, C, H, W = frame1.shape
    fx = flow[:, 0]
    fy = flow[:, 1]
    xs = jnp.arange(W, dtype=jnp.float32)[None, None, :]
    ys = jnp.arange(H, dtype=jnp.float32)[None, :, None]
    pos_x = xs + fx
    pos_y = ys + fy
    gx = pos_x / W * 2.0 - 1.0
    gy = pos_y / H * 2.0 - 1.0
    ix = jnp.clip((gx + 1.0) * 0.5 * (W - 1), 0.0, W - 1)
    iy = jnp.clip((gy + 1.0) * 0.5 * (H - 1), 0.0, H - 1)
    x0 = jnp.floor(ix).astype(jnp.int32)
    y0 = jnp.floor(iy).astype(jnp.int32)
    wx = ix - x0
    wy = iy - y0
    x1 = jnp.minimum(x0 + 1, W - 1)
    y1 = jnp.minimum(y0 + 1, H - 1)

    flat = frame2.reshape(N, C, H * W)

    def gather(yi, xi):
        idx = (yi * W + xi).reshape(N, 1, H * W)
        g = jnp.take_along_axis(flat, jnp.broadcast_to(idx, (N, C, H * W)), axis=2)
        return g.reshape(N, C, H, W)

    warped = (gather(y0, x0) * ((1 - wx) * (1 - wy))[:, None] +
              gather(y0, x1) * (wx * (1 - wy))[:, None] +
              gather(y1, x0) * ((1 - wx) * wy)[:, None] +
              gather(y1, x1) * (wx * wy)[:, None])
    photo = frame1 - warped
    return jnp.sum((photo ** 2 + delta ** 2) ** alpha)


if __name__ == "__main__":
    # PhotoMetric(delta, alpha) parameters (deterministic, in-script).
    delta = 0.001
    alpha = 0.45

    N, C, H, W = 2, 4, 16, 16
    key = jax.random.PRNGKey(0)
    k1, k2, k3 = jax.random.split(key, 3)
    frame1 = jax.random.normal(k1, (N, C, H, W), dtype=jnp.float32)
    frame2 = jax.random.normal(k2, (N, C, H, W), dtype=jnp.float32)
    flow = jax.random.uniform(k3, (N, 2, H, W), dtype=jnp.float32,
                              minval=-3.0, maxval=3.0)

    loss = photometric_loss(frame1, frame2, flow, delta, alpha)
    loss = jax.block_until_ready(loss)

    ref = jax.block_until_ready(_reference_loss(frame1, frame2, flow, delta, alpha))
    # Tolerance deliberately covers bf16 MXU operands (~2^-8 relative on frame2 / weights).
    np.testing.assert_allclose(np.asarray(loss), np.asarray(ref), rtol=1e-2, atol=1e-2)

    print("KERNEL_OK")
</pallas_src>

<mosaic_0001>
module attributes {stable_mosaic.version = 11 : i64} {
  func.func @_photometric_kernel(%arg0: i32, %arg1: i32, %arg2: memref<2x256xf32, #tpu.memory_space<vmem>>, %arg3: memref<1x4x256xf32, #tpu.memory_space<vmem>>, %arg4: memref<1x64x16xbf16, #tpu.memory_space<vmem>>, %arg5: memref<1x2x256xf32, #tpu.memory_space<vmem>>, %arg6: memref<1x1x8x128xf32, #tpu.memory_space<vmem>>) attributes {dimension_semantics = [#tpu.dimension_semantics<parallel>, #tpu.dimension_semantics<parallel>], iteration_bounds = array<i64: 2, 1>, scalar_prefetch = 0 : i64, scratch_operands = 0 : i64, tpu.core_type = #tpu.core_type<tc>, window_params = [{transform_indices = @transform_0, window_bounds = array<i64: 2, 256>}, {transform_indices = @transform_1, window_bounds = array<i64: 1, 4, 256>}, {transform_indices = @transform_2, window_bounds = array<i64: 1, 64, 16>}, {transform_indices = @transform_3, window_bounds = array<i64: 1, 2, 256>}, {transform_indices = @transform_4, window_bounds = array<i64: 1, 1, 8, 128>}]} {
    %c0 = arith.constant 0 : index
    %c0_0 = arith.constant 0 : index
    %0 = vector.load %arg2[%c0, %c0_0] : memref<2x256xf32, #tpu.memory_space<vmem>>, vector<1x256xf32>
    %c0_1 = arith.constant 0 : index
    %c0_2 = arith.constant 0 : index
    %c0_3 = arith.constant 0 : index
    %1 = vector.load %arg5[%c0_1, %c0_2, %c0_3] : memref<1x2x256xf32, #tpu.memory_space<vmem>>, vector<1x1x256xf32>
    %2 = vector.shape_cast %1 : vector<1x1x256xf32> to vector<1x256xf32>
    %3 = arith.addf %0, %2 : vector<1x256xf32>
    %cst = arith.constant 9.375000e-01 : f32
    %4 = vector.broadcast %cst : f32 to vector<1x256xf32>
    %5 = arith.mulf %3, %4 : vector<1x256xf32>
    %cst_4 = arith.constant 0.000000e+00 : f32
    %cst_5 = arith.constant 1.500000e+01 : f32
    %6 = vector.broadcast %cst_4 : f32 to vector<1x256xf32>
    %7 = arith.maximumf %6, %5 : vector<1x256xf32>
    %8 = vector.broadcast %cst_5 : f32 to vector<1x256xf32>
    %9 = arith.minimumf %8, %7 : vector<1x256xf32>
    %c1 = arith.constant 1 : index
    %c0_6 = arith.constant 0 : index
    %10 = vector.load %arg2[%c1, %c0_6] : memref<2x256xf32, #tpu.memory_space<vmem>>, vector<1x256xf32>
    %c0_7 = arith.constant 0 : index
    %c1_8 = arith.constant 1 : index
    %c0_9 = arith.constant 0 : index
    %11 = vector.load %arg5[%c0_7, %c1_8, %c0_9] : memref<1x2x256xf32, #tpu.memory_space<vmem>>, vector<1x1x256xf32>
    %12 = vector.shape_cast %11 : vector<1x1x256xf32> to vector<1x256xf32>
    %13 = arith.addf %10, %12 : vector<1x256xf32>
    %cst_10 = arith.constant 9.375000e-01 : f32
    %14 = vector.broadcast %cst_10 : f32 to vector<1x256xf32>
    %15 = arith.mulf %13, %14 : vector<1x256xf32>
    %cst_11 = arith.constant 0.000000e+00 : f32
    %cst_12 = arith.constant 1.500000e+01 : f32
    %16 = vector.broadcast %cst_11 : f32 to vector<1x256xf32>
    %17 = arith.maximumf %16, %15 : vector<1x256xf32>
    %18 = vector.broadcast %cst_12 : f32 to vector<1x256xf32>
    %19 = arith.minimumf %18, %17 : vector<1x256xf32>
    %20 = tpu.iota {dimensions = array<i32: 0>} : vector<16x256xi32>
    %21 = arith.sitofp %20 : vector<16x256xi32> to vector<16x256xf32>
    %22 = tpu.iota {dimensions = array<i32: 0>} : vector<16x256xi32>
    %23 = arith.sitofp %22 : vector<16x256xi32> to vector<16x256xf32>
    %24 = vector.broadcast %9 : vector<1x256xf32> to vector<16x256xf32>
    %25 = arith.subf %21, %24 : vector<16x256xf32>
    %26 = math.absf %25 : vector<16x256xf32>
    %cst_13 = arith.constant 1.000000e+00 : f32
    %27 = vector.broadcast %cst_13 : f32 to vector<16x256xf32>
    %28 = arith.subf %27, %26 : vector<16x256xf32>
    %cst_14 = arith.constant 0.000000e+00 : f32
    %29 = vector.broadcast %cst_14 : f32 to vector<16x256xf32>
    %30 = arith.maximumf %28, %29 : vector<16x256xf32>
    %31 = vector.broadcast %19 : vector<1x256xf32> to vector<16x256xf32>
    %32 = arith.subf %23, %31 : vector<16x256xf32>
    %33 = math.absf %32 : vector<16x256xf32>
    %cst_15 = arith.constant 1.000000e+00 : f32
    %34 = vector.broadcast %cst_15 : f32 to vector<16x256xf32>
    %35 = arith.subf %34, %33 : vector<16x256xf32>
    %cst_16 = arith.constant 0.000000e+00 : f32
    %36 = vector.broadcast %cst_16 : f32 to vector<16x256xf32>
    %37 = arith.maximumf %35, %36 : vector<16x256xf32>
    %c0_17 = arith.constant 0 : index
    %c0_18 = arith.constant 0 : index
    %c0_19 = arith.constant 0 : index
    %38 = vector.load %arg4[%c0_17, %c0_18, %c0_19] : memref<1x64x16xbf16, #tpu.memory_space<vmem>>, vector<1x64x16xbf16>
    %39 = vector.shape_cast %38 : vector<1x64x16xbf16> to vector<64x16xbf16>
    %40 = arith.truncf %30 : vector<16x256xf32> to vector<16x256xbf16>
    %cst_20 = arith.constant dense<0.000000e+00> : vector<64x256xf32>
    %41 = tpu.matmul %39, %40, %cst_20 {dimension_numbers = #tpu.dot_dimension_numbers<[1], [0], [0], [1], [0, 0, 1, 1], [], []>} : vector<64x16xbf16>, vector<16x256xbf16>, vector<64x256xf32> -> vector<64x256xf32>
    %42 = vector.shape_cast %41 : vector<64x256xf32> to vector<4x16x256xf32>
    %43 = vector.shape_cast %37 : vector<16x256xf32> to vector<1x16x256xf32>
    %44 = vector.broadcast %43 : vector<1x16x256xf32> to vector<4x16x256xf32>
    %45 = arith.mulf %42, %44 : vector<4x16x256xf32>
    %cst_21 = arith.constant dense<0.000000e+00> : vector<4x256xf32>
    %46 = vector.multi_reduction <add>, %45, %cst_21 [1] : vector<4x16x256xf32> to vector<4x256xf32>
    %c0_22 = arith.constant 0 : index
    %c0_23 = arith.constant 0 : index
    %c0_24 = arith.constant 0 : index
    %47 = vector.load %arg3[%c0_22, %c0_23, %c0_24] : memref<1x4x256xf32, #tpu.memory_space<vmem>>, vector<1x4x256xf32>
    %48 = vector.shape_cast %47 : vector<1x4x256xf32> to vector<4x256xf32>
    %49 = arith.subf %48, %46 : vector<4x256xf32>
    %50 = arith.mulf %49, %49 : vector<4x256xf32>
    %cst_25 = arith.constant 9.99999997E-7 : f32
    %51 = vector.broadcast %cst_25 : f32 to vector<4x256xf32>
    %52 = arith.addf %50, %51 : vector<4x256xf32>
    %53 = math.log %52 : vector<4x256xf32>
    %cst_26 = arith.constant 4.500000e-01 : f32
    %54 = vector.broadcast %cst_26 : f32 to vector<4x256xf32>
    %55 = arith.mulf %54, %53 : vector<4x256xf32>
    %56 = math.exp %55 : vector<4x256xf32>
    %57 = vector.extract_strided_slice %56 {offsets = [0, 0], sizes = [4, 128], strides = [1, 1]} : vector<4x256xf32> to vector<4x128xf32>
    %58 = vector.extract_strided_slice %56 {offsets = [0, 128], sizes = [4, 128], strides = [1, 1]} : vector<4x256xf32> to vector<4x128xf32>
    %59 = arith.addf %57, %58 : vector<4x128xf32>
    %cst_27 = arith.constant 0.000000e+00 : f32
    %60 = vector.broadcast %cst_27 : f32 to vector<4x128xf32>
    %61 = tpu.concatenate %59, %60 in 0 : vector<4x128xf32>, vector<4x128xf32> -> vector<8x128xf32>
    %c0_28 = arith.constant 0 : index
    %c0_29 = arith.constant 0 : index
    %c0_30 = arith.constant 0 : index
    %c0_31 = arith.constant 0 : index
    %62 = vector.load %arg6[%c0_28, %c0_29, %c0_30, %c0_31] : memref<1x1x8x128xf32, #tpu.memory_space<vmem>>, vector<1x1x8x128xf32>
    %63 = vector.shape_cast %62 : vector<1x1x8x128xf32> to vector<8x128xf32>
    %64 = vector.shape_cast %61 : vector<8x128xf32> to vector<1x1x8x128xf32>
    tpu.vector_store %arg6[%c0_28, %c0_29, %c0_30, %c0_31], %64 {strides = array<i32>} : memref<1x1x8x128xf32, #tpu.memory_space<vmem>>, vector<1x1x8x128xf32>,
    return
  }
  func.func @transform_0(%arg0: i32, %arg1: i32) -> (i32, i32) {
    %c0_i32 = arith.constant 0 : i32
    %c0_i32_0 = arith.constant 0 : i32
    return %c0_i32, %arg1 : i32, i32
  }
  func.func @transform_1(%arg0: i32, %arg1: i32) -> (i32, i32, i32) {
    %c0_i32 = arith.constant 0 : i32
    %c0_i32_0 = arith.constant 0 : i32
    return %arg0, %c0_i32, %arg1 : i32, i32, i32
  }
  func.func @transform_2(%arg0: i32, %arg1: i32) -> (i32, i32, i32) {
    %c0_i32 = arith.constant 0 : i32
    %c0_i32_0 = arith.constant 0 : i32
    %c0_i32_1 = arith.constant 0 : i32
    return %arg0, %c0_i32, %c0_i32_0 : i32, i32, i32
  }
  func.func @transform_3(%arg0: i32, %arg1: i32) -> (i32, i32, i32) {
    %c0_i32 = arith.constant 0 : i32
    %c0_i32_0 = arith.constant 0 : i32
    return %arg0, %c0_i32, %arg1 : i32, i32, i32
  }
  func.func @transform_4(%arg0: i32, %arg1: i32) -> (i32, i32, i32, i32) {
    %c0_i32 = arith.constant 0 : i32
    %c0_i32_0 = arith.constant 0 : i32
    %c0_i32_1 = arith.constant 0 : i32
    return %arg0, %arg1, %c0_i32, %c0_i32_0 : i32, i32, i32, i32
  }
}

</mosaic_0001>

<bundles_post_ra>
// kernel: tpu_custom_call.1
= control target key start
LH: loop header
LB: loop body
LE: loop exit
PB: predicated region body
PF: predicated region fallthrough
CT: control target
= control target key end

     0   :  { %9 = vsyncpa [#allocation3], 0  ;;  %s1082_s0 = inlined_call_operand.vmem [shape: f32[2,256], index: 0, kind: input, shape index: {}]   ;;  %s1083_s1 = inlined_call_operand.vmem [shape: f32[2,4,256], index: 1, kind: input, shape index: {}]   ;;  %s1084_s2 = inlined_call_operand.vmem [shape: bf16[2,64,16], index: 2, kind: input, shape index: {}]   ;;  %s1085_s3 = inlined_call_operand.vmem [shape: f32[2,2,256], index: 3, kind: input, shape index: {}]   ;;  %s1086_s4 = inlined_call_operand.hbm [shape: f32[2,1,8,128], index: 4, kind: output, shape index: {}]  }
   0x1   :  { %11 = vsyncpa [#allocation3 + $0x1], 0  ;;  %s947_s15 = smov 0   ;;  %s949_s16 = smov 0  }
   0x2   :  { %s951_s17 = smov 0   ;;  %s953_s18 = smov 0  }
   0x3   :  { %s955_s19 = smov 0   ;;  %s957_s20 = smov 0  }
   0x4 LB: > { %s744_s21 = sadd.s32 4294967295, %s918_s20   ;;  %s745_s22 = sadd.s32 4294967294, %s918_s20   ;;  %s918_s20 = sphi %s957_s20, %s17_s20   ;;  %s914_s19 = sphi %s955_s19, %s1093_s19   ;;  %s910_s18 = sphi %s953_s18, %s1092_s18   ;;  %s906_s17 = sphi %s951_s17, %s1091_s17   ;;  %s902_s16 = sphi %s949_s16, %s1090_s16   ;;  %s898_s15 = sphi %s947_s15, %s1089_s15  }
   0x5   : > { %s29_s23 = sadd.s32 1, %s914_s19  ;;  %s146_s24 = sadd.s32 1, %s906_s17 }
   0x6   : > { %p31_p0 = scmp.ge.s32.totalorder %s29_s23, 2  ;;  %p156_p1 = scmp.ne.s32.totalorder %s906_s17, %s902_s16 }
   0x7   : > { %p157_p2 = scmp.eq.s32.totalorder %s744_s21, 1  ;;  %p162_p3 = scmp.ne.s32.totalorder %s902_s16, %s898_s15 }
   0x8   : > { %s1095_s23 = smov (%p31_p0, %s29_s23), 0  ;;  %p163_p5 = scmp.eq.s32.totalorder %s745_s22, 1 }
   0x9   : > { %p987_p4 = por %p157_p2, %p156_p1  ;;  %s141_s26 = ssub.s32 %s914_s19, %s1095_s23 }
   0xa   : > { %p749_p6 = scmp.ge.s32.totalorder %s918_s20, 1  ;;  %p144_p7 = scmp.eq.s32.totalorder %s141_s26, 0 }
   0xb   : > { %p994_p8 = por %p163_p5, %p162_p3  ;;  %p224_p9 = scmp.lt.s32.totalorder %s918_s20, 3 }
   0xc   : > { %s1000_s28 = scalar_select %p144_p7, %s906_s17, %s146_s24  }
   0xd   : > { %p225_p10 = pnand %p749_p6, %p224_p9 }
   0xe   : > { %p280_p11 = scmp.lt.s32.totalorder (!%p225_p10), %s910_s18, 1  ;;  %v319_v0 = vlaneseq (!%p225_p10)  ;;  %v920_v1 = vmov (!%p225_p10), 0   ;;  %v305_v2 = vld [vmem:[%s1082_s0] ss:$2 sm:$0x3] (!%p225_p10)  ;;  %vm408_vm0 = vcmask (!%p225_p10), 130048  }
   0xf   : > { %228 = sbr.rel (%p225_p10) target bundleno = 353 (0x161), region = 36  ;;  %453 = vmatprep.mubr.bf16.mxu0 (!%p225_p10), %v920_v1  ;;  %473 = vmatprep.mubr.bf16.mxu1 (!%p225_p10), %v920_v1  ;;  %v757_v3 = vld [vmem:[%s1082_s0 + $0x1] ss:$2 sm:$0x3] (!%p225_p10)  ;;  %vm580_vm1 = vcmask (!%p225_p10), 1041409   ;;  %vm582_vm2 = vcmask (!%p225_p10), 1045509  }
  0x10   : > { %v320_v4 = vshrl.u32 (!%p225_p10), %v319_v0, 7  ;;  %vm585_vm3 = vcmask (!%p225_p10), 1042434   ;;  %vm587_vm4 = vcmask (!%p225_p10), 1046534   ;;  %vm590_vm5 = vcmask (!%p225_p10), 1043459  }
  0x11   : > { %vm592_vm6 = vcmask (!%p225_p10), 1047559   ;;  %vm607_vm7 = vcmask (!%p225_p10), 1043456  }
  0x12   : > { %v321_v9 = vadd.s32 (!%p225_p10), 8, %v320_v4  ;;  %v331_v14 = vsub.s32 (!%p225_p10), 1, %v320_v4  ;;  %v327_v15 = vsub.s32 (!%p225_p10), 0, %v320_v4  ;;  %v322_v18 = vcvt.s32.f32 (!%p225_p10), %v320_v4 }
  0x14   : > { %v323_v19 = vcvt.s32.f32 (!%p225_p10), %v321_v9 }
  0x16   : > { %s1004_s29 = scalar_select %p280_p11, %s910_s18, 1 }
  0x18   : > { %s772_s6 = sshll.u32 %s1004_s29, 5  ;;  %s773_s7 = sshll.u32 %s1004_s29, 2 }
  0x19   : > { %s302_s12 = scalar_lea.vmem %s1085_s3, %s773_s7  ;;  %s1020_s21 = scalar_lea.vmem %s1084_s2, %s772_s6 }
  0x1a   : > { %v306_v5 = vld [vmem:[%s302_s12] ss:$2 sm:$0x3]  ;;  %v758_v6 = vld [vmem:[%s302_s12 + $0x1] ss:$2 sm:$0x3] }
  0x1b   : > { %v307_v7 = vadd.f32 %v306_v5, %v305_v2  ;;  %v315_v8 = vadd.f32 %v758_v6, %v757_v3  ;;  %v832_v42 = vld [vmem:[%s1020_s21] sm:$0xff]   ;;  %v833_v43 = vld [vmem:[%s1020_s21 + $0x10] sm:$0xff]   ;;  %v834_v44 = vld [vmem:[%s1020_s21 + $0x8] sm:$0xff]   ;;  %s771_s22 = sshll.u32 %s1004_s29, 3  ;;  %s270_s29 = sand.u32 1, %s902_s16  }
  0x1c   : > { %v835_v45 = vld [vmem:[%s1020_s21 + $0x18] sm:$0xff]   ;;  %s287_s30 = scalar_lea.vmem %s1083_s1, %s771_s22  ;;  %s750_s5 = sshll.u32 %s270_s29, 3 }
  0x1d   : > { %v308_v10 = vmul.f32 0.9375, %v307_v7  ;;  %v316_v11 = vmul.f32 0.9375, %v315_v8  ;;  %s768_s6 = sshll.u32 %s910_s18, 7  ;;  %s272_s7 = scalar_lea.vmem [#allocation2], %s750_s5 }
  0x1e   : > { %s625_s8 = sshll.u32 %s272_s7, 4  ;;  %s1035_s11 = scalar_lea.hbm %s1086_s4, %s768_s6  ;;  %s1037_s8 = int_to_ptr.vmem [resolvable:$true] %s625_s8 }
  0x1f   : > { %v309_v12 = vmax.f32 %v308_v10, 0.0  ;;  %v317_v13 = vmax.f32 %v316_v11, 0.0  ;;  %s611_s12 = scalar_lea.sflag [#allocation3], %s270_s29  ;;  %s840_s13 = scalar_lea.vmem %s1037_s8, 128 }
  0x20   : > { %p841_p12 = scmp.ne.s32.totalorder %s1037_s8, %s840_s13  ;;  %s921_s18 = smov [#allocation2]  }
  0x21   : > { %v310_v16 = vmin.f32 %v309_v12, 15.0  ;;  %v318_v17 = vmin.f32 %v317_v13, 15.0  ;;  %s844_s14 = sshll.u32 %s921_s18, 4  ;;  %s845_s14 = int_to_ptr.vmem [resolvable:$false] %s844_s14 }
  0x22   : > { %p842_p13 = pnand %p841_p12, %p987_p4  ;;  %s846_s21 = scalar_lea.vmem %s845_s14, 256 }
  0x23   : > { %v332_v20 = vrot.slane %v310_v16, %v331_v14  ;;  %v359_v21 = vrot.slane %v318_v17, %v331_v14  ;;  %v328_v22 = vrot.slane %v310_v16, %v327_v15  ;;  %v355_v23 = vrot.slane %v318_v17, %v327_v15  ;;  %p847_p1 = scmp.lt.s32.totalorder %s1037_s8, %s845_s14  ;;  %p848_p2 = scmp.lt.s32.totalorder %s846_s21, %s840_s13 }
  0x24   : > { %p843_p0 = pneg %p842_p13 }
  0x25   : > { %v336_v24 = vsub.f32 %v322_v18, %v332_v20  ;;  %v338_v25 = vsub.f32 %v323_v19, %v332_v20  ;;  %v335_v26 = vsub.f32 %v322_v18, %v328_v22  ;;  %v337_v27 = vsub.f32 %v323_v19, %v328_v22  ;;  %p849_p3 = por %p848_p2, %p847_p1 }
  0x26   : > { %v362_v46 = vsub.f32 %v322_v18, %v355_v23  ;;  %v363_v47 = vsub.f32 %v322_v18, %v359_v21  ;;  %v364_v48 = vsub.f32 %v323_v19, %v355_v23  ;;  %v365_v49 = vsub.f32 %v323_v19, %v359_v21 }
  0x27   : > { %v340_v28 = vand.u32 2147483647, %v336_v24  ;;  %v342_v29 = vand.u32 2147483647, %v338_v25  ;;  %v339_v30 = vand.u32 2147483647, %v335_v26  ;;  %p850_p5 = pnand %p849_p3, %p843_p0 }
  0x28   : > { %v341_v31 = vand.u32 2147483647, %v337_v27  ;;  %v366_v50 = vand.u32 2147483647, %v362_v46  ;;  %v367_v51 = vand.u32 2147483647, %v363_v47 }
  0x29   : > { %v344_v32 = vsub.f32 1.0, %v340_v28  ;;  %v346_v33 = vsub.f32 1.0, %v342_v29  ;;  %v343_v34 = vsub.f32 1.0, %v339_v30  ;;  %v368_v52 = vand.u32 2147483647, %v364_v48 }
  0x2a   : > { %v345_v35 = vsub.f32 1.0, %v341_v31  ;;  %v369_v53 = vand.u32 2147483647, %v365_v49  ;;  %v370_v54 = vsub.f32 1.0, %v366_v50  ;;  %v371_v55 = vsub.f32 1.0, %v367_v51 }
  0x2b   : > { %v348_v36 = vmax.f32 %v344_v32, 0.0  ;;  %v350_v37 = vmax.f32 %v346_v33, 0.0  ;;  %v347_v38 = vmax.f32 %v343_v34, 0.0  ;;  %v372_v56 = vsub.f32 1.0, %v368_v52 }
  0x2c   : > { %v349_v39 = vmax.f32 %v345_v35, 0.0  ;;  %v373_v57 = vsub.f32 1.0, %v369_v53  ;;  %v374_v58 = vmax.f32 %v370_v54, 0.0  ;;  %v375_v59 = vmax.f32 %v371_v55, 0.0 }
  0x2d   : > { %v387_v40 = vpack.c.bf16 %v350_v37, %v348_v36  ;;  %v376_v60 = vmax.f32 %v372_v56, 0.0 }
  0x2e   : > { %v386_v41 = vpack.c.bf16 %v349_v39, %v347_v38  ;;  %v377_v63 = vmax.f32 %v373_v57, 0.0 }
  0x2f   : > { %421 = vmatprep.subr.bf16.mxu0 %v387_v40  ;;  %774 = vmatprep.subr.bf16.mxu1 %v387_v40 }
  0x30   : > { %422 = vmatpush1.bf16.msra.mxu0 %v386_v41  ;;  %775 = vmatpush1.bf16.msra.mxu1 %v386_v41 }
  0x33   : > { %763 = vmatmul.mubr.msk.bf16.vlgmr.msra.gmra.mrb[0].mxu0 %vm408_vm0, %v832_v42  ;;  %765 = vmatmul.mubr.msk.bf16.vlgmr.msra.gmra.mrb[0].mxu1 %vm408_vm0, %v833_v43 }
  0x34   : > { %463 = vmatprep.mubr.bf16.mxu0 %v920_v1  ;;  %483 = vmatprep.mubr.bf16.mxu1 %v920_v1 }
  0x3b   : > { %764 = vmatmul.mubr.msk.bf16.gmra.mrb[4].mxu0 %vm408_vm0, %v834_v44  ;;  %766 = vmatmul.mubr.msk.bf16.gmra.mrb[4].mxu1 %vm408_vm0, %v835_v45 }
 0x106   : > { %v455_v61 = vpop.f32.mrb[0].mxu0  ;;  %v475_v62 = vpop.f32.mrb[0].mxu1 }
 0x107   : > { %v494_v0 = vmul.f32 %v455_v61, %v374_v58  ;;  %v502_v1 = vmul.f32 %v475_v62, %v374_v58  ;;  %v457_v2 = vpop.f32.mrb[1].mxu0  ;;  %v477_v3 = vpop.f32.mrb[1].mxu1 }
 0x108   : > { %v495_v4 = vmul.f32 %v457_v2, %v375_v59  ;;  %v503_v5 = vmul.f32 %v477_v3, %v375_v59  ;;  %v459_v6 = vpop.f32.mrb[2].mxu0  ;;  %v479_v7 = vpop.f32.mrb[2].mxu1 }
 0x109   : > { %v496_v8 = vmul.f32 %v459_v6, %v376_v60  ;;  %v504_v9 = vmul.f32 %v479_v7, %v376_v60  ;;  %v461_v10 = vpop.f32.mrb[3].mxu0  ;;  %v481_v11 = vpop.f32.mrb[3].mxu1 }
 0x10a   : > { %v497_v12 = vmul.f32 %v461_v10, %v377_v63  ;;  %v505_v13 = vmul.f32 %v481_v11, %v377_v63 }
 0x10b   : > { %v510_v14 = vadd.f32 %v496_v8, %v494_v0  ;;  %v538_v15 = vadd.f32 %v504_v9, %v502_v1 }
 0x10c   : > { %v517_v16 = vadd.f32 %v497_v12, %v495_v4  ;;  %v545_v17 = vadd.f32 %v505_v13, %v503_v5 }
 0x10d   : > { %v511_v18 = vrot.slane %v510_v14, 4  ;;  %v539_v19 = vrot.slane %v538_v15, 4 }
 0x10e   : > { %v518_v20 = vrot.slane %v517_v16, 4  ;;  %v546_v21 = vrot.slane %v545_v17, 4  ;;  %v465_v22 = vpop.f32.mrb[4].mxu0  ;;  %v485_v23 = vpop.f32.mrb[4].mxu1 }
 0x10f   : > { %v512_v24 = vadd.f32 %v511_v18, %v510_v14  ;;  %v540_v25 = vadd.f32 %v539_v19, %v538_v15  ;;  %v498_v26 = vmul.f32 %v465_v22, %v374_v58  ;;  %v506_v27 = vmul.f32 %v485_v23, %v374_v58  ;;  %v467_v28 = vpop.f32.mrb[5].mxu0  ;;  %v487_v29 = vpop.f32.mrb[5].mxu1 }
 0x110   : > { %v519_v30 = vadd.f32 %v518_v20, %v517_v16  ;;  %v547_v31 = vadd.f32 %v546_v21, %v545_v17  ;;  %v499_v32 = vmul.f32 %v467_v28, %v375_v59  ;;  %v507_v33 = vmul.f32 %v487_v29, %v375_v59  ;;  %v469_v34 = vpop.f32.mrb[6].mxu0  ;;  %v489_v35 = vpop.f32.mrb[6].mxu1 }
 0x111   : > { %v513_v36 = vrot.slane %v512_v24, 2  ;;  %v541_v37 = vrot.slane %v540_v25, 2  ;;  %v500_v38 = vmul.f32 %v469_v34, %v376_v60  ;;  %v508_v39 = vmul.f32 %v489_v35, %v376_v60  ;;  %v471_v40 = vpop.f32.mrb[7].mxu0  ;;  %v491_v41 = vpop.f32.mrb[7].mxu1 }
 0x112   : > { %v520_v42 = vrot.slane %v519_v30, 2  ;;  %v548_v43 = vrot.slane %v547_v31, 2  ;;  %v501_v44 = vmul.f32 %v471_v40, %v377_v63  ;;  %v509_v45 = vmul.f32 %v491_v41, %v377_v63 }
 0x113   : > { %v514_v46 = vadd.f32 %v513_v36, %v512_v24  ;;  %v542_v47 = vadd.f32 %v541_v37, %v540_v25  ;;  %v524_v48 = vadd.f32 %v500_v38, %v498_v26  ;;  %v552_v49 = vadd.f32 %v508_v39, %v506_v27 }
 0x114   : > { %v521_v50 = vadd.f32 %v520_v42, %v519_v30  ;;  %v549_v51 = vadd.f32 %v548_v43, %v547_v31  ;;  %v531_v52 = vadd.f32 %v501_v44, %v499_v32  ;;  %v559_v53 = vadd.f32 %v509_v45, %v507_v33  ;;  %v566_v32 = vld [vmem:[%s287_s30] sm:$0xff] }
 0x115   : > { %v515_v54 = vrot.slane %v514_v46, 1  ;;  %v543_v55 = vrot.slane %v542_v47, 1  ;;  %v525_v56 = vrot.slane %v524_v48, 4  ;;  %v553_v57 = vrot.slane %v552_v49, 4 }
 0x116   : > { %v522_v58 = vrot.slane %v521_v50, 1  ;;  %v550_v59 = vrot.slane %v549_v51, 1  ;;  %v532_v60 = vrot.slane %v531_v52, 4  ;;  %v560_v61 = vrot.slane %v559_v53, 4 }
 0x117   : > { %v516_v62 = vadd.f32 %v515_v54, %v514_v46  ;;  %v544_v0 = vadd.f32 %v543_v55, %v542_v47  ;;  %v526_v1 = vadd.f32 %v525_v56, %v524_v48  ;;  %v554_v63 = vadd.f32 %v553_v57, %v552_v49 }
 0x118   : > { %v523_v2 = vadd.f32 %v522_v58, %v521_v50  ;;  %v551_v3 = vadd.f32 %v550_v59, %v549_v51  ;;  %v533_v4 = vadd.f32 %v532_v60, %v531_v52  ;;  %v561_v5 = vadd.f32 %v560_v61, %v559_v53 }
 0x119   : > { %v527_v6 = vrot.slane %v526_v1, 2  ;;  %v555_v7 = vrot.slane %v554_v63, 2 }
 0x11a   : > { %v575_v8 = vcombine.low %v516_v62, %v523_v2  ;;  %v577_v9 = vcombine.low %v544_v0, %v551_v3  ;;  %v534_v10 = vrot.slane %v533_v4, 2  ;;  %v562_v11 = vrot.slane %v561_v5, 2 }
 0x11b   : > { %v528_v12 = vadd.f32 %v527_v6, %v526_v1  ;;  %v556_v13 = vadd.f32 %v555_v7, %v554_v63 }
 0x11c   : > { %v535_v14 = vadd.f32 %v534_v10, %v533_v4  ;;  %v563_v15 = vadd.f32 %v562_v11, %v561_v5  ;;  %v584_v27 = vrot.slane %v577_v9, 6 }
 0x11d   : > { %v529_v16 = vrot.slane %v528_v12, 1  ;;  %v557_v17 = vrot.slane %v556_v13, 1 }
 0x11e   : > { %v536_v18 = vrot.slane %v535_v14, 1  ;;  %v564_v19 = vrot.slane %v563_v15, 1 }
 0x11f   : > { %v530_v20 = vadd.f32 %v529_v16, %v528_v12  ;;  %v558_v21 = vadd.f32 %v557_v17, %v556_v13 }
 0x120   : > { %v537_v22 = vadd.f32 %v536_v18, %v535_v14  ;;  %v565_v23 = vadd.f32 %v564_v19, %v563_v15 }
 0x122   : > { %v576_v24 = vcombine.low %v530_v20, %v537_v22  ;;  %v578_v25 = vcombine.low %v558_v21, %v565_v23 }
 0x124   : > { %v579_v26 = vrot.slane %v576_v24, 7  ;;  %v589_v31 = vrot.slane %v578_v25, 5 }
 0x126   : > { %v581_v28 = vsel %vm580_vm1, %v579_v26, %v575_v8 }
 0x127   : > { %v583_v29 = vsel %vm582_vm2, %v579_v26, %v581_v28 }
 0x128   : > { %v586_v30 = vsel %vm585_vm3, %v584_v27, %v583_v29 }
 0x129   : > { %v588_v33 = vsel %vm587_vm4, %v584_v27, %v586_v30 }
 0x12a   : > { %v591_v34 = vsel %vm590_vm5, %v589_v31, %v588_v33 }
 0x12b   : > { %v593_v35 = vsel %vm592_vm6, %v589_v31, %v591_v34 }
 0x12c   : > { %v595_v36 = vsub.f32 %v566_v32, %v593_v35 }
 0x12e   : > { %v596_v37 = vmul.f32 %v595_v36, %v595_v36 }
 0x130   : > { %v597_v38 = vadd.f32 1e-06, %v596_v37 }
 0x132   : > { %836 = vlog2.f32 %v597_v38 }
 0x13c   : > { %v837_v39 = vpop.eup %836 }
 0x13d   : > { %v599_v40 = vmul.f32 0.6931472, %v837_v39 }
 0x13f   : > { %v600_v41 = vmul.f32 0.45, %v599_v40 }
 0x141   : > { %v601_v42 = vmul.f32 1.442695, %v600_v41 }
 0x143   : > { %838 = vpow2.f32 %v601_v42 }
 0x14d   : > { %v839_v43 = vpop.eup %838 }
 0x14e   : > { %v604_v44 = vrot.slane %v839_v43, 4 }
 0x150   : > { %v606_v45 = vadd.f32 %v839_v43, %v604_v44 }
 0x152   : > { %v608_v46 = vsel %vm607_vm7, %v606_v45, 0.0 }
 0x153   : > { %609 = vst [vmem:[%s272_s7] sm:$0xff] %v608_v46 }
 0x154   : > { %853 = shalt.err (!%p850_p5)
}
 0x155   : > { %s854_s22 = scalar_lea.hbm %s1035_s11, 128  ;;  %s858_s30 = scalar_lea.hbm %s1086_s4, 256 }
 0x156   : > { %p855_p6 = scmp.ne.s32.totalorder %s1035_s11, %s854_s22  ;;  %p859_p10 = scmp.lt.u32.totalorder %s1035_s11, %s1086_s4 }
 0x157   : > { %p860_p11 = scmp.lt.u32.totalorder %s858_s30, %s854_s22  ;;  %p862_p13 = scmp.lt.u32.totalorder %s854_s22, %s1035_s11 }
 0x158   : > { %p856_p7 = pnand %p855_p6, %p987_p4 }
 0x159   : > { %p861_p12 = por %p860_p11, %p859_p10 }
 0x15a   : > { %p857_p9 = pneg %p856_p7 }
 0x15b   : > { %p863_p0 = por %p862_p13, %p861_p12 }
 0x15d   : > { %p864_p1 = pnand %p863_p0, %p857_p9 }
 0x15f   : > { %867 = shalt.err (!%p864_p1)
}
 0x160   : > { %776 = dma.vmem_to_hbm [thread:$0]  (%p987_p4), %s1037_s8, 128, %s1035_s11, %s611_s12  }
 0x161 PF: > { %p782_p2 = scmp.ge.s32.totalorder %s918_s20, 2  ;;  %s637_s6 = sand.u32 1, %s898_s15  }
 0x162   : > { %s638_s7 = scalar_lea.sflag [#allocation3], %s637_s6 }
 0x163   : > { %p779_p3 = pnand %p782_p2, %p994_p8 }
 0x165   : > { %893 = dma.done.wait (!%p779_p3), %s638_s7, 128  }
 0x166   : > { %895 = vsyncadd (!%p779_p3), %s638_s7, 4294967168  ;;  %s17_s20 = sadd.s32 1, %s918_s20   ;;  %s1089_s15 = smov %s902_s16 }
 0x167   : > { %p14_p5 = scmp.ge.s32.totalorder %s17_s20, 4   ;;  %s1090_s16 = smov %s906_s17 }
 0x168   : > { %s1091_s17 = smov %s1000_s28  ;;  %s1092_s18 = smov %s914_s19 }
 0x169   : > { %s1093_s19 = smov %s1095_s23  ;;  %16 = sbr.rel (!%p14_p5) target bundleno = 4 (0x4), region = 82 }
 0x170   :  { %643 = vsyncpa [#allocation3], 1 }
 0x171   :  { %645 = vsyncpa [#allocation3 + $0x1], 1 }

</bundles_post_ra>
